<compile_context>
chip_gen: v6e
topology: v6e:2x2x1
jax: 0.10.0
libtpu: 0.0.40
codegen_flags: <defaults>
</compile_context>

<pallas_src>
import functools

import jax
import jax.numpy as jnp
from jax import lax
from jax.experimental import pallas as pl
from jax.experimental.pallas import tpu as pltpu


def _cdiv(a, b):
    return (a + b - 1) // b


def _geometry_ce_kernel(pred_ref, target_ref, *refs, bin_number, bin_size,
                        range_, n_total, block_n, tiles_per_core):
    if range_ == 360:
        out_refs = refs[:5]
        out_lse, out_gt, out_gl, out_gr, out_cr = out_refs
        out_cl = None
        iota_ref = refs[5]
    else:
        out_refs = refs[:6]
        out_lse, out_gt, out_gl, out_gr, out_cr, out_cl = out_refs
        iota_ref = refs[6]

    p = pl.program_id(0)          # megacore split ("parallel")
    i = pl.program_id(1)          # batch tiles   ("arbitrary")
    c, tn = pred_ref.shape

    @pl.when(i == 0)
    def _init():
        # Class-index iota is constant across grid steps: build it once per core
        # into VMEM scratch and re-read it (vld slots have slack, VALU doesn't).
        iota_ref[...] = lax.broadcasted_iota(jnp.int32, (c, tn), 0)
        for r in out_refs:
            r[...] = jnp.zeros_like(r)

    global_tile = p * tiles_per_core + i
    tile_start = global_tile * block_n
    # Only the globally-last (possibly ragged) tile -- and the fully-empty
    # filler tiles of the rectangular (num_p, tiles_per_core) grid -- need the
    # mask; every other tile takes the unmasked fast path.
    needs_mask = tile_start + block_n > n_total

    inv_n = jnp.float32(1.0 / n_total)
    inv_bin = jnp.float32(1.0 / bin_size)

    def accumulate(masked):
        pred = pred_ref[...].astype(jnp.float32)      # (C, TN) classes on sublanes
        tgt = target_ref[...].astype(jnp.float32)     # (1, TN) batch on lanes
        if masked:
            col = lax.broadcasted_iota(jnp.int32, (1, tn), 1) + tile_start
            valid = col < n_total                     # (1, TN) bool
            # Select (NaN/Inf safe), not multiply: out-of-range lanes of a
            # partial boundary block hold undefined bits.
            pred = jnp.where(valid, pred, 0.0)
            tgt = jnp.where(valid, tgt, 0.0)

        # Per-sample (per-lane) log-sum-exp over the class (sublane) axis.
        row_max = jnp.max(pred, axis=0, keepdims=True)                  # (1, TN)
        lse = row_max + jnp.log(
            jnp.sum(jnp.exp(pred - row_max), axis=0, keepdims=True))
        if masked:
            lse = jnp.where(valid, lse, 0.0)

        # True division inside the floor so `target // binSize` matches PyTorch.
        tl_f = jnp.floor(tgt / jnp.float32(bin_size))                   # (1, TN)
        tl = tl_f.astype(jnp.int32)
        left = jnp.where(tl == 0, bin_number - 1, tl - 1)
        right = jnp.where(tl == bin_number - 1, 0, tl + 1)

        iota = iota_ref[...]                                            # (C, TN)

        def pick_sum(label):
            # Gathered-logit total: one int compare + one select + one full
            # (C, TN) reduce straight to a scalar.
            return jnp.sum(jnp.where(iota == label, pred, 0.0))

        g_t = pick_sum(tl)
        g_l = pick_sum(left)
        g_r = pick_sum(right)

        # `weight` never goes through a floor, so a reciprocal multiply is safe.
        weight = (tgt - tl_f * jnp.float32(bin_size)) * inv_bin         # (1, TN)

        if range_ == 360:
            c_r = weight                      # c_left handled analytically
            s_cl = None
        else:
            not_smallest = tgt != 0.0
            # Faithful to the original code: compares the raw angle against the
            # bin index binNumber-1 (flagged upstream as suspicious).
            not_largest = tgt != jnp.float32(bin_number - 1)
            c_r = jnp.where(not_largest, weight, 0.0)
            s_cl = jnp.sum(jnp.where(not_smallest, 1.0 - weight, 0.0))
            # (masked lanes: tgt == 0 -> not_smallest False -> contribute 0)

        # Scale per-tile partials by 1/N while accumulating so the running sums
        # stay O(1) regardless of the batch size.
        out_lse[...] += jnp.sum(lse) * inv_n
        out_gt[...] += g_t * inv_n
        out_gl[...] += g_l * inv_n
        out_gr[...] += g_r * inv_n
        out_cr[...] += jnp.sum(c_r) * inv_n
        if out_cl is not None:
            out_cl[...] += s_cl * inv_n

    @pl.when(jnp.logical_not(needs_mask))
    def _steady():
        accumulate(masked=False)

    @pl.when(needs_mask)
    def _tail():
        accumulate(masked=True)


def geometry_ce_loss(pred, target, range_, *, block_n=32768, num_core_splits=2):
    """Pallas implementation of GeometryCELoss(range_)(pred, target)."""
    n, c = pred.shape
    bin_size = range_ / c

    # Lane-dense layout: classes on sublanes, batch on lanes.  This transpose is
    # the only wrapper-side relayout (the pad copy was removed).
    # TODO(synk): push the transpose upstream if the producer can emit (C, N).
    pred_t = jnp.transpose(pred)                               # (C, N)
    tgt = jnp.reshape(target, (1, n)).astype(jnp.float32)      # (1, N)

    # Tile size: multiples of 128 lanes, never larger than the 128-aligned batch
    # (so no block starts beyond the array).  32768 fits the default scoped VMEM
    # on v5e (16 MiB) / v6e / v7x (32 MiB); on v6e it can be raised to
    # 65536-131072 together with CompilerParams(vmem_limit_bytes=...) to
    # amortize the ~0.35us/step grid overhead; keep <=65536 on v7x (64 MiB
    # physical VMEM) and v5e.
    if n <= 128:
        block_n = n
    else:
        block_n = max(128, min(block_n, (n // 128) * 128))
        block_n = (block_n // 128) * 128

    n_tiles = _cdiv(n, block_n)
    num_p = 1 if n_tiles < 2 else num_core_splits   # 2 -> both v7x TensorCores
    tiles_per_core = _cdiv(n_tiles, num_p)
    last_tile = n_tiles - 1

    def data_idx(p, i):
        # Clamp so trailing filler tiles of the rectangular grid re-read the
        # last real tile; the kernel masks them out entirely (validity comes
        # from the *unclamped* global tile index).
        return (0, jnp.minimum(p * tiles_per_core + i, last_tile))

    def out_idx(p, i):
        return (p, 0, 0)

    n_out = 5 if range_ == 360 else 6
    out_shape = tuple(jax.ShapeDtypeStruct((num_p, 1, 128), jnp.float32)
                      for _ in range(n_out))
    out_specs = tuple(pl.BlockSpec((1, 1, 128), out_idx) for _ in range(n_out))

    kernel = functools.partial(
        _geometry_ce_kernel, bin_number=c, bin_size=bin_size, range_=range_,
        n_total=n, block_n=block_n, tiles_per_core=tiles_per_core)

    itemsize = jnp.dtype(pred.dtype).itemsize
    cost = pl.CostEstimate(
        flops=14 * n * c + 24 * n,
        transcendentals=n * c + n,
        bytes_accessed=n * c * itemsize + n * 4 + num_p * n_out * 128 * 4,
    )

    # VMEM: double-buffered (C, TN) + (1, TN) input blocks, one (C, TN) int32
    # iota scratch and a few (C, TN) transients -- ~6-8 MiB at TN=32768 / f32,
    # inside the default scoped VMEM on every current generation.
    outs = pl.pallas_call(
        kernel,
        out_shape=out_shape,
        grid=(num_p, tiles_per_core),
        in_specs=[
            pl.BlockSpec((c, block_n), data_idx),   # pred   (C, TN)
            pl.BlockSpec((1, block_n), data_idx),   # target (1, TN)
        ],
        out_specs=out_specs,
        scratch_shapes=[pltpu.VMEM((c, block_n), jnp.int32)],   # hoisted iota
        compiler_params=pltpu.CompilerParams(
            dimension_semantics=("parallel", "arbitrary")),
        cost_estimate=cost,
    )(pred_t, tgt)

    # Tiny scalar combination of the per-core partial means (pure JAX).
    sums = [jnp.sum(o[:, 0, 0]) for o in outs]
    m_lse, m_gt, m_gl, m_gr, m_cr = sums[:5]
    ce_t = m_lse - m_gt          # CE_x = mean(lse) - mean(gathered logit_x)
    ce_l = m_lse - m_gl
    ce_r = m_lse - m_gr
    if range_ == 360:
        m_cl = 1.0 - m_cr        # mean(1 - w) == 1 - mean(w)
    else:
        m_cl = sums[5]
    return ce_t + m_cr * ce_r + m_cl * ce_l


def _reference(pred, target, range_):
    """Pure-JAX reference mirroring the PyTorch code."""
    n, c = pred.shape
    bin_size = range_ / c
    logp = jax.nn.log_softmax(pred.astype(jnp.float32), axis=-1)
    tgt = target.astype(jnp.float32)
    true_label = jnp.floor(tgt / bin_size).astype(jnp.int32)
    left_label = jnp.mod(true_label - 1 + c, c)
    right_label = jnp.mod(true_label + 1, c)

    def ce_mean(labels):
        picked = jnp.take_along_axis(logp, labels[:, None], axis=1)[:, 0]
        return -jnp.mean(picked)

    ce_t, ce_l, ce_r = ce_mean(true_label), ce_mean(left_label), ce_mean(right_label)
    distance = tgt - true_label.astype(jnp.float32) * bin_size
    weight = distance / bin_size
    if range_ == 360:
        loss = ce_t + weight * ce_r + (1.0 - weight) * ce_l
    else:
        not_smallest = (tgt != 0.0).astype(jnp.float32)
        not_largest = (tgt != float(c - 1)).astype(jnp.float32)
        loss = ce_t + not_largest * weight * ce_r + not_smallest * (1.0 - weight) * ce_l
    return jnp.mean(loss)


def _check(got, want):
    assert jnp.allclose(got, want, atol=1e-4, rtol=1e-5), (got, want)


if __name__ == "__main__":
    key = jax.random.PRNGKey(0)
    k_pred, k_tgt = jax.random.split(key)

    N, BINS = 8, 8          # 8 samples, 8 angle bins
    RANGE = 360             # range==360 branch (binSize = 45)

    pred = jax.random.normal(k_pred, (N, BINS), dtype=jnp.float32)
    target = jax.random.randint(k_tgt, (N,), 0, RANGE).astype(jnp.float32)

    # range == 360 branch (single sub-128 block, no filler tiles).
    loss_360 = geometry_ce_loss(pred, target, RANGE)
    jax.block_until_ready(loss_360)
    _check(loss_360, _reference(pred, target, RANGE))

    # non-360 branch (e.g. range = 180).
    target_180 = jax.random.randint(jax.random.PRNGKey(1), (N,), 0, 180).astype(jnp.float32)
    loss_180 = geometry_ce_loss(pred, target_180, 180)
    jax.block_until_ready(loss_180)
    _check(loss_180, _reference(pred, target_180, 180))

    # Multi-tile + ragged tail + empty filler tile: 300 samples, forced 128-lane
    # blocks -> 3 real tiles on a (2, 2) grid.
    N2 = 300
    kp2, kt2 = jax.random.split(jax.random.PRNGKey(2))
    pred2 = jax.random.normal(kp2, (N2, BINS), dtype=jnp.float32)
    target2 = jax.random.randint(kt2, (N2,), 0, RANGE).astype(jnp.float32)
    loss_tiled = geometry_ce_loss(pred2, target2, RANGE, block_n=128)
    jax.block_until_ready(loss_tiled)
    _check(loss_tiled, _reference(pred2, target2, RANGE))

    # Two-core split with one real tile per core (p=1 owns the ragged tail).
    N3 = 1000
    kp3, kt3 = jax.random.split(jax.random.PRNGKey(3))
    pred3 = jax.random.normal(kp3, (N3, BINS), dtype=jnp.float32)
    target3 = jax.random.randint(kt3, (N3,), 0, RANGE).astype(jnp.float32)
    loss_split = geometry_ce_loss(pred3, target3, RANGE)
    jax.block_until_ready(loss_split)
    _check(loss_split, _reference(pred3, target3, RANGE))

    print("KERNEL_OK")
</pallas_src>

<mosaic_0001>
module attributes {stable_mosaic.version = 11 : i64} {
  func.func @_geometry_ce_kernel(%arg0: i32, %arg1: i32, %arg2: memref<8x8xf32, #tpu.memory_space<vmem>>, %arg3: memref<1x8xf32, #tpu.memory_space<vmem>>, %arg4: memref<1x1x128xf32, #tpu.memory_space<vmem>>, %arg5: memref<1x1x128xf32, #tpu.memory_space<vmem>>, %arg6: memref<1x1x128xf32, #tpu.memory_space<vmem>>, %arg7: memref<1x1x128xf32, #tpu.memory_space<vmem>>, %arg8: memref<1x1x128xf32, #tpu.memory_space<vmem>>, %arg9: memref<8x8xi32, #tpu.memory_space<vmem>>) attributes {dimension_semantics = [#tpu.dimension_semantics<parallel>, #tpu.dimension_semantics<arbitrary>], iteration_bounds = array<i64: 1, 1>, scalar_prefetch = 0 : i64, scratch_operands = 1 : i64, tpu.core_type = #tpu.core_type<tc>, window_params = [{transform_indices = @transform_0, window_bounds = array<i64: 8, 8>}, {transform_indices = @transform_1, window_bounds = array<i64: 1, 8>}, {transform_indices = @transform_2, window_bounds = array<i64: 1, 1, 128>}, {transform_indices = @transform_3, window_bounds = array<i64: 1, 1, 128>}, {transform_indices = @transform_4, window_bounds = array<i64: 1, 1, 128>}, {transform_indices = @transform_5, window_bounds = array<i64: 1, 1, 128>}, {transform_indices = @transform_6, window_bounds = array<i64: 1, 1, 128>}]} {
    %c0_i32 = arith.constant 0 : i32
    %0 = arith.cmpi eq, %arg1, %c0_i32 : i32
    %1 = arith.extui %0 : i1 to i32
    %c0_i32_0 = arith.constant 0 : i32
    %2 = arith.cmpi ne, %1, %c0_i32_0 : i32
    scf.if %2 {
      %13 = tpu.iota {dimensions = array<i32: 0>} : vector<8x8xi32>
      %c0 = arith.constant 0 : index
      %c0_8 = arith.constant 0 : index
      %14 = vector.load %arg9[%c0, %c0_8] : memref<8x8xi32, #tpu.memory_space<vmem>>, vector<8x8xi32>
      tpu.vector_store %arg9[%c0, %c0_8], %13 {strides = array<i32>} : memref<8x8xi32, #tpu.memory_space<vmem>>, vector<8x8xi32>,
      %cst_9 = arith.constant 0.000000e+00 : f32
      %15 = vector.broadcast %cst_9 : f32 to vector<1x1x128xf32>
      %c0_10 = arith.constant 0 : index
      %c0_11 = arith.constant 0 : index
      %c0_12 = arith.constant 0 : index
      %16 = vector.load %arg4[%c0_10, %c0_11, %c0_12] : memref<1x1x128xf32, #tpu.memory_space<vmem>>, vector<1x1x128xf32>
      tpu.vector_store %arg4[%c0_10, %c0_11, %c0_12], %15 {strides = array<i32>} : memref<1x1x128xf32, #tpu.memory_space<vmem>>, vector<1x1x128xf32>,
      %cst_13 = arith.constant 0.000000e+00 : f32
      %17 = vector.broadcast %cst_13 : f32 to vector<1x1x128xf32>
      %c0_14 = arith.constant 0 : index
      %c0_15 = arith.constant 0 : index
      %c0_16 = arith.constant 0 : index
      %18 = vector.load %arg5[%c0_14, %c0_15, %c0_16] : memref<1x1x128xf32, #tpu.memory_space<vmem>>, vector<1x1x128xf32>
      tpu.vector_store %arg5[%c0_14, %c0_15, %c0_16], %17 {strides = array<i32>} : memref<1x1x128xf32, #tpu.memory_space<vmem>>, vector<1x1x128xf32>,
      %cst_17 = arith.constant 0.000000e+00 : f32
      %19 = vector.broadcast %cst_17 : f32 to vector<1x1x128xf32>
      %c0_18 = arith.constant 0 : index
      %c0_19 = arith.constant 0 : index
      %c0_20 = arith.constant 0 : index
      %20 = vector.load %arg6[%c0_18, %c0_19, %c0_20] : memref<1x1x128xf32, #tpu.memory_space<vmem>>, vector<1x1x128xf32>
      tpu.vector_store %arg6[%c0_18, %c0_19, %c0_20], %19 {strides = array<i32>} : memref<1x1x128xf32, #tpu.memory_space<vmem>>, vector<1x1x128xf32>,
      %cst_21 = arith.constant 0.000000e+00 : f32
      %21 = vector.broadcast %cst_21 : f32 to vector<1x1x128xf32>
      %c0_22 = arith.constant 0 : index
      %c0_23 = arith.constant 0 : index
      %c0_24 = arith.constant 0 : index
      %22 = vector.load %arg7[%c0_22, %c0_23, %c0_24] : memref<1x1x128xf32, #tpu.memory_space<vmem>>, vector<1x1x128xf32>
      tpu.vector_store %arg7[%c0_22, %c0_23, %c0_24], %21 {strides = array<i32>} : memref<1x1x128xf32, #tpu.memory_space<vmem>>, vector<1x1x128xf32>,
      %cst_25 = arith.constant 0.000000e+00 : f32
      %23 = vector.broadcast %cst_25 : f32 to vector<1x1x128xf32>
      %c0_26 = arith.constant 0 : index
      %c0_27 = arith.constant 0 : index
      %c0_28 = arith.constant 0 : index
      %24 = vector.load %arg8[%c0_26, %c0_27, %c0_28] : memref<1x1x128xf32, #tpu.memory_space<vmem>>, vector<1x1x128xf32>
      tpu.vector_store %arg8[%c0_26, %c0_27, %c0_28], %23 {strides = array<i32>} : memref<1x1x128xf32, #tpu.memory_space<vmem>>, vector<1x1x128xf32>,
    } else {
    }
    %c1_i32 = arith.constant 1 : i32
    %3 = arith.muli %arg0, %c1_i32 : i32
    %4 = arith.addi %3, %arg1 : i32
    %c8_i32 = arith.constant 8 : i32
    %5 = arith.muli %4, %c8_i32 : i32
    %c8_i32_1 = arith.constant 8 : i32
    %6 = arith.addi %5, %c8_i32_1 : i32
    %c8_i32_2 = arith.constant 8 : i32
    %7 = arith.cmpi sgt, %6, %c8_i32_2 : i32
    %true = arith.constant true
    %8 = arith.xori %7, %true : i1
    %9 = arith.extui %8 : i1 to i32
    %cst = arith.constant 0.0222222228 : f32
    %cst_3 = arith.constant 1.250000e-01 : f32
    %c0_i32_4 = arith.constant 0 : i32
    %10 = arith.cmpi ne, %9, %c0_i32_4 : i32
    scf.if %10 {
      %c0 = arith.constant 0 : index
      %c0_8 = arith.constant 0 : index
      %13 = vector.load %arg2[%c0, %c0_8] : memref<8x8xf32, #tpu.memory_space<vmem>>, vector<8x8xf32>
      %c0_9 = arith.constant 0 : index
      %c0_10 = arith.constant 0 : index
      %14 = vector.load %arg3[%c0_9, %c0_10] : memref<1x8xf32, #tpu.memory_space<vmem>>, vector<1x8xf32>
      %cst_11 = arith.constant dense<0xFF800000> : vector<8xf32>
      %15 = vector.multi_reduction <maximumf>, %13, %cst_11 [0] : vector<8x8xf32> to vector<8xf32>
      %16 = vector.shape_cast %15 : vector<8xf32> to vector<1x8xf32>
      %17 = vector.broadcast %16 : vector<1x8xf32> to vector<8x8xf32>
      %18 = arith.subf %13, %17 : vector<8x8xf32>
      %19 = math.exp %18 : vector<8x8xf32>
      %cst_12 = arith.constant dense<0.000000e+00> : vector<8xf32>
      %20 = vector.multi_reduction <add>, %19, %cst_12 [0] : vector<8x8xf32> to vector<8xf32>
      %21 = vector.shape_cast %20 : vector<8xf32> to vector<1x8xf32>
      %22 = math.log %21 : vector<1x8xf32>
      %23 = arith.addf %16, %22 : vector<1x8xf32>
      %cst_13 = arith.constant 4.500000e+01 : f32
      %24 = vector.broadcast %cst_13 : f32 to vector<1x8xf32>
      %25 = arith.divf %14, %24 : vector<1x8xf32>
      %26 = math.floor %25 : vector<1x8xf32>
      %27 = arith.fptosi %26 : vector<1x8xf32> to vector<1x8xi32>
      %c0_i32_14 = arith.constant 0 : i32
      %28 = vector.broadcast %c0_i32_14 : i32 to vector<1x8xi32>
      %29 = arith.cmpi eq, %27, %28 : vector<1x8xi32>
      %c1_i32_15 = arith.constant 1 : i32
      %30 = vector.broadcast %c1_i32_15 : i32 to vector<1x8xi32>
      %31 = arith.subi %27, %30 : vector<1x8xi32>
      %c7_i32 = arith.constant 7 : i32
      %32 = vector.broadcast %c7_i32 : i32 to vector<1x8xi32>
      %33 = arith.select %29, %32, %31 : vector<1x8xi1>, vector<1x8xi32>
      %c7_i32_16 = arith.constant 7 : i32
      %34 = vector.broadcast %c7_i32_16 : i32 to vector<1x8xi32>
      %35 = arith.cmpi eq, %27, %34 : vector<1x8xi32>
      %c1_i32_17 = arith.constant 1 : i32
      %36 = vector.broadcast %c1_i32_17 : i32 to vector<1x8xi32>
      %37 = arith.addi %27, %36 : vector<1x8xi32>
      %c0_i32_18 = arith.constant 0 : i32
      %38 = vector.broadcast %c0_i32_18 : i32 to vector<1x8xi32>
      %39 = arith.select %35, %38, %37 : vector<1x8xi1>, vector<1x8xi32>
      %c0_19 = arith.constant 0 : index
      %c0_20 = arith.constant 0 : index
      %40 = vector.load %arg9[%c0_19, %c0_20] : memref<8x8xi32, #tpu.memory_space<vmem>>, vector<8x8xi32>
      %41 = vector.broadcast %27 : vector<1x8xi32> to vector<8x8xi32>
      %42 = arith.cmpi eq, %40, %41 : vector<8x8xi32>
      %cst_21 = arith.constant 0.000000e+00 : f32
      %43 = vector.broadcast %cst_21 : f32 to vector<8x8xf32>
      %44 = arith.select %42, %13, %43 : vector<8x8xi1>, vector<8x8xf32>
      %45 = vector.shape_cast %44 : vector<8x8xf32> to vector<1x8x8xf32>
      %cst_22 = arith.constant dense<0.000000e+00> : vector<1xf32>
      %46 = vector.multi_reduction <add>, %45, %cst_22 [1, 2] : vector<1x8x8xf32> to vector<1xf32>
      %47 = vector.shape_cast %46 : vector<1xf32> to vector<1x1x1xf32>
      %48 = vector.extract %47[0, 0, 0] : f32 from vector<1x1x1xf32>
      %49 = vector.broadcast %33 : vector<1x8xi32> to vector<8x8xi32>
      %50 = arith.cmpi eq, %40, %49 : vector<8x8xi32>
      %cst_23 = arith.constant 0.000000e+00 : f32
      %51 = vector.broadcast %cst_23 : f32 to vector<8x8xf32>
      %52 = arith.select %50, %13, %51 : vector<8x8xi1>, vector<8x8xf32>
      %53 = vector.shape_cast %52 : vector<8x8xf32> to vector<1x8x8xf32>
      %cst_24 = arith.constant dense<0.000000e+00> : vector<1xf32>
      %54 = vector.multi_reduction <add>, %53, %cst_24 [1, 2] : vector<1x8x8xf32> to vector<1xf32>
      %55 = vector.shape_cast %54 : vector<1xf32> to vector<1x1x1xf32>
      %56 = vector.extract %55[0, 0, 0] : f32 from vector<1x1x1xf32>
      %57 = vector.broadcast %39 : vector<1x8xi32> to vector<8x8xi32>
      %58 = arith.cmpi eq, %40, %57 : vector<8x8xi32>
      %cst_25 = arith.constant 0.000000e+00 : f32
      %59 = vector.broadcast %cst_25 : f32 to vector<8x8xf32>
      %60 = arith.select %58, %13, %59 : vector<8x8xi1>, vector<8x8xf32>
      %61 = vector.shape_cast %60 : vector<8x8xf32> to vector<1x8x8xf32>
      %cst_26 = arith.constant dense<0.000000e+00> : vector<1xf32>
      %62 = vector.multi_reduction <add>, %61, %cst_26 [1, 2] : vector<1x8x8xf32> to vector<1xf32>
      %63 = vector.shape_cast %62 : vector<1xf32> to vector<1x1x1xf32>
      %64 = vector.extract %63[0, 0, 0] : f32 from vector<1x1x1xf32>
      %cst_27 = arith.constant 4.500000e+01 : f32
      %65 = vector.broadcast %cst_27 : f32 to vector<1x8xf32>
      %66 = arith.mulf %26, %65 : vector<1x8xf32>
      %67 = arith.subf %14, %66 : vector<1x8xf32>
      %68 = vector.broadcast %cst : f32 to vector<1x8xf32>
      %69 = arith.mulf %67, %68 : vector<1x8xf32>
      %c0_28 = arith.constant 0 : index
      %c0_29 = arith.constant 0 : index
      %c0_30 = arith.constant 0 : index
      %70 = vector.load %arg4[%c0_28, %c0_29, %c0_30] : memref<1x1x128xf32, #tpu.memory_space<vmem>>, vector<1x1x128xf32>
      %71 = vector.shape_cast %23 : vector<1x8xf32> to vector<1x1x8xf32>
      %cst_31 = arith.constant dense<0.000000e+00> : vector<1xf32>
      %72 = vector.multi_reduction <add>, %71, %cst_31 [1, 2] : vector<1x1x8xf32> to vector<1xf32>
      %73 = vector.shape_cast %72 : vector<1xf32> to vector<1x1x1xf32>
      %74 = vector.extract %73[0, 0, 0] : f32 from vector<1x1x1xf32>
      %75 = arith.mulf %74, %cst_3 : f32
      %76 = vector.broadcast %75 : f32 to vector<1x1x128xf32>
      %77 = arith.addf %70, %76 : vector<1x1x128xf32>
      %c0_32 = arith.constant 0 : index
      %c0_33 = arith.constant 0 : index
      %c0_34 = arith.constant 0 : index
      %78 = vector.load %arg4[%c0_32, %c0_33, %c0_34] : memref<1x1x128xf32, #tpu.memory_space<vmem>>, vector<1x1x128xf32>
      tpu.vector_store %arg4[%c0_32, %c0_33, %c0_34], %77 {strides = array<i32>} : memref<1x1x128xf32, #tpu.memory_space<vmem>>, vector<1x1x128xf32>,
      %c0_35 = arith.constant 0 : index
      %c0_36 = arith.constant 0 : index
      %c0_37 = arith.constant 0 : index
      %79 = vector.load %arg5[%c0_35, %c0_36, %c0_37] : memref<1x1x128xf32, #tpu.memory_space<vmem>>, vector<1x1x128xf32>
      %80 = arith.mulf %48, %cst_3 : f32
      %81 = vector.broadcast %80 : f32 to vector<1x1x128xf32>
      %82 = arith.addf %79, %81 : vector<1x1x128xf32>
      %c0_38 = arith.constant 0 : index
      %c0_39 = arith.constant 0 : index
      %c0_40 = arith.constant 0 : index
      %83 = vector.load %arg5[%c0_38, %c0_39, %c0_40] : memref<1x1x128xf32, #tpu.memory_space<vmem>>, vector<1x1x128xf32>
      tpu.vector_store %arg5[%c0_38, %c0_39, %c0_40], %82 {strides = array<i32>} : memref<1x1x128xf32, #tpu.memory_space<vmem>>, vector<1x1x128xf32>,
      %c0_41 = arith.constant 0 : index
      %c0_42 = arith.constant 0 : index
      %c0_43 = arith.constant 0 : index
      %84 = vector.load %arg6[%c0_41, %c0_42, %c0_43] : memref<1x1x128xf32, #tpu.memory_space<vmem>>, vector<1x1x128xf32>
      %85 = arith.mulf %56, %cst_3 : f32
      %86 = vector.broadcast %85 : f32 to vector<1x1x128xf32>
      %87 = arith.addf %84, %86 : vector<1x1x128xf32>
      %c0_44 = arith.constant 0 : index
      %c0_45 = arith.constant 0 : index
      %c0_46 = arith.constant 0 : index
      %88 = vector.load %arg6[%c0_44, %c0_45, %c0_46] : memref<1x1x128xf32, #tpu.memory_space<vmem>>, vector<1x1x128xf32>
      tpu.vector_store %arg6[%c0_44, %c0_45, %c0_46], %87 {strides = array<i32>} : memref<1x1x128xf32, #tpu.memory_space<vmem>>, vector<1x1x128xf32>,
      %c0_47 = arith.constant 0 : index
      %c0_48 = arith.constant 0 : index
      %c0_49 = arith.constant 0 : index
      %89 = vector.load %arg7[%c0_47, %c0_48, %c0_49] : memref<1x1x128xf32, #tpu.memory_space<vmem>>, vector<1x1x128xf32>
      %90 = arith.mulf %64, %cst_3 : f32
      %91 = vector.broadcast %90 : f32 to vector<1x1x128xf32>
      %92 = arith.addf %89, %91 : vector<1x1x128xf32>
      %c0_50 = arith.constant 0 : index
      %c0_51 = arith.constant 0 : index
      %c0_52 = arith.constant 0 : index
      %93 = vector.load %arg7[%c0_50, %c0_51, %c0_52] : memref<1x1x128xf32, #tpu.memory_space<vmem>>, vector<1x1x128xf32>
      tpu.vector_store %arg7[%c0_50, %c0_51, %c0_52], %92 {strides = array<i32>} : memref<1x1x128xf32, #tpu.memory_space<vmem>>, vector<1x1x128xf32>,
      %c0_53 = arith.constant 0 : index
      %c0_54 = arith.constant 0 : index
      %c0_55 = arith.constant 0 : index
      %94 = vector.load %arg8[%c0_53, %c0_54, %c0_55] : memref<1x1x128xf32, #tpu.memory_space<vmem>>, vector<1x1x128xf32>
      %95 = vector.shape_cast %69 : vector<1x8xf32> to vector<1x1x8xf32>
      %cst_56 = arith.constant dense<0.000000e+00> : vector<1xf32>
      %96 = vector.multi_reduction <add>, %95, %cst_56 [1, 2] : vector<1x1x8xf32> to vector<1xf32>
      %97 = vector.shape_cast %96 : vector<1xf32> to vector<1x1x1xf32>
      %98 = vector.extract %97[0, 0, 0] : f32 from vector<1x1x1xf32>
      %99 = arith.mulf %98, %cst_3 : f32
      %100 = vector.broadcast %99 : f32 to vector<1x1x128xf32>
      %101 = arith.addf %94, %100 : vector<1x1x128xf32>
      %c0_57 = arith.constant 0 : index
      %c0_58 = arith.constant 0 : index
      %c0_59 = arith.constant 0 : index
      %102 = vector.load %arg8[%c0_57, %c0_58, %c0_59] : memref<1x1x128xf32, #tpu.memory_space<vmem>>, vector<1x1x128xf32>
      tpu.vector_store %arg8[%c0_57, %c0_58, %c0_59], %101 {strides = array<i32>} : memref<1x1x128xf32, #tpu.memory_space<vmem>>, vector<1x1x128xf32>,
    } else {
    }
    %11 = arith.extui %7 : i1 to i32
    %cst_5 = arith.constant 0.0222222228 : f32
    %cst_6 = arith.constant 1.250000e-01 : f32
    %c0_i32_7 = arith.constant 0 : i32
    %12 = arith.cmpi ne, %11, %c0_i32_7 : i32
    scf.if %12 {
      %c0 = arith.constant 0 : index
      %c0_8 = arith.constant 0 : index
      %13 = vector.load %arg2[%c0, %c0_8] : memref<8x8xf32, #tpu.memory_space<vmem>>, vector<8x8xf32>
      %c0_9 = arith.constant 0 : index
      %c0_10 = arith.constant 0 : index
      %14 = vector.load %arg3[%c0_9, %c0_10] : memref<1x8xf32, #tpu.memory_space<vmem>>, vector<1x8xf32>
      %15 = tpu.iota {dimensions = array<i32: 1>} : vector<1x8xi32>
      %16 = vector.broadcast %5 : i32 to vector<1x8xi32>
      %17 = arith.addi %15, %16 : vector<1x8xi32>
      %c8_i32_11 = arith.constant 8 : i32
      %18 = vector.broadcast %c8_i32_11 : i32 to vector<1x8xi32>
      %19 = arith.cmpi slt, %17, %18 : vector<1x8xi32>
      %cst_12 = arith.constant 0.000000e+00 : f32
      %20 = vector.shape_cast %19 : vector<1x8xi1> to vector<1x8xi1>
      %21 = vector.broadcast %20 : vector<1x8xi1> to vector<8x8xi1>
      %22 = vector.broadcast %cst_12 : f32 to vector<8x8xf32>
      %23 = arith.select %21, %13, %22 : vector<8x8xi1>, vector<8x8xf32>
      %cst_13 = arith.constant 0.000000e+00 : f32
      %24 = vector.broadcast %cst_13 : f32 to vector<1x8xf32>
      %25 = arith.select %19, %14, %24 : vector<1x8xi1>, vector<1x8xf32>
      %cst_14 = arith.constant dense<0xFF800000> : vector<8xf32>
      %26 = vector.multi_reduction <maximumf>, %23, %cst_14 [0] : vector<8x8xf32> to vector<8xf32>
      %27 = vector.shape_cast %26 : vector<8xf32> to vector<1x8xf32>
      %28 = vector.broadcast %27 : vector<1x8xf32> to vector<8x8xf32>
      %29 = arith.subf %23, %28 : vector<8x8xf32>
      %30 = math.exp %29 : vector<8x8xf32>
      %cst_15 = arith.constant dense<0.000000e+00> : vector<8xf32>
      %31 = vector.multi_reduction <add>, %30, %cst_15 [0] : vector<8x8xf32> to vector<8xf32>
      %32 = vector.shape_cast %31 : vector<8xf32> to vector<1x8xf32>
      %33 = math.log %32 : vector<1x8xf32>
      %34 = arith.addf %27, %33 : vector<1x8xf32>
      %cst_16 = arith.constant 0.000000e+00 : f32
      %35 = vector.broadcast %cst_16 : f32 to vector<1x8xf32>
      %36 = arith.select %19, %34, %35 : vector<1x8xi1>, vector<1x8xf32>
      %cst_17 = arith.constant 4.500000e+01 : f32
      %37 = vector.broadcast %cst_17 : f32 to vector<1x8xf32>
      %38 = arith.divf %25, %37 : vector<1x8xf32>
      %39 = math.floor %38 : vector<1x8xf32>
      %40 = arith.fptosi %39 : vector<1x8xf32> to vector<1x8xi32>
      %c0_i32_18 = arith.constant 0 : i32
      %41 = vector.broadcast %c0_i32_18 : i32 to vector<1x8xi32>
      %42 = arith.cmpi eq, %40, %41 : vector<1x8xi32>
      %c1_i32_19 = arith.constant 1 : i32
      %43 = vector.broadcast %c1_i32_19 : i32 to vector<1x8xi32>
      %44 = arith.subi %40, %43 : vector<1x8xi32>
      %c7_i32 = arith.constant 7 : i32
      %45 = vector.broadcast %c7_i32 : i32 to vector<1x8xi32>
      %46 = arith.select %42, %45, %44 : vector<1x8xi1>, vector<1x8xi32>
      %c7_i32_20 = arith.constant 7 : i32
      %47 = vector.broadcast %c7_i32_20 : i32 to vector<1x8xi32>
      %48 = arith.cmpi eq, %40, %47 : vector<1x8xi32>
      %c1_i32_21 = arith.constant 1 : i32
      %49 = vector.broadcast %c1_i32_21 : i32 to vector<1x8xi32>
      %50 = arith.addi %40, %49 : vector<1x8xi32>
      %c0_i32_22 = arith.constant 0 : i32
      %51 = vector.broadcast %c0_i32_22 : i32 to vector<1x8xi32>
      %52 = arith.select %48, %51, %50 : vector<1x8xi1>, vector<1x8xi32>
      %c0_23 = arith.constant 0 : index
      %c0_24 = arith.constant 0 : index
      %53 = vector.load %arg9[%c0_23, %c0_24] : memref<8x8xi32, #tpu.memory_space<vmem>>, vector<8x8xi32>
      %54 = vector.broadcast %40 : vector<1x8xi32> to vector<8x8xi32>
      %55 = arith.cmpi eq, %53, %54 : vector<8x8xi32>
      %cst_25 = arith.constant 0.000000e+00 : f32
      %56 = vector.broadcast %cst_25 : f32 to vector<8x8xf32>
      %57 = arith.select %55, %23, %56 : vector<8x8xi1>, vector<8x8xf32>
      %58 = vector.shape_cast %57 : vector<8x8xf32> to vector<1x8x8xf32>
      %cst_26 = arith.constant dense<0.000000e+00> : vector<1xf32>
      %59 = vector.multi_reduction <add>, %58, %cst_26 [1, 2] : vector<1x8x8xf32> to vector<1xf32>
      %60 = vector.shape_cast %59 : vector<1xf32> to vector<1x1x1xf32>
      %61 = vector.extract %60[0, 0, 0] : f32 from vector<1x1x1xf32>
      %62 = vector.broadcast %46 : vector<1x8xi32> to vector<8x8xi32>
      %63 = arith.cmpi eq, %53, %62 : vector<8x8xi32>
      %cst_27 = arith.constant 0.000000e+00 : f32
      %64 = vector.broadcast %cst_27 : f32 to vector<8x8xf32>
      %65 = arith.select %63, %23, %64 : vector<8x8xi1>, vector<8x8xf32>
      %66 = vector.shape_cast %65 : vector<8x8xf32> to vector<1x8x8xf32>
      %cst_28 = arith.constant dense<0.000000e+00> : vector<1xf32>
      %67 = vector.multi_reduction <add>, %66, %cst_28 [1, 2] : vector<1x8x8xf32> to vector<1xf32>
      %68 = vector.shape_cast %67 : vector<1xf32> to vector<1x1x1xf32>
      %69 = vector.extract %68[0, 0, 0] : f32 from vector<1x1x1xf32>
      %70 = vector.broadcast %52 : vector<1x8xi32> to vector<8x8xi32>
      %71 = arith.cmpi eq, %53, %70 : vector<8x8xi32>
      %cst_29 = arith.constant 0.000000e+00 : f32
      %72 = vector.broadcast %cst_29 : f32 to vector<8x8xf32>
      %73 = arith.select %71, %23, %72 : vector<8x8xi1>, vector<8x8xf32>
      %74 = vector.shape_cast %73 : vector<8x8xf32> to vector<1x8x8xf32>
      %cst_30 = arith.constant dense<0.000000e+00> : vector<1xf32>
      %75 = vector.multi_reduction <add>, %74, %cst_30 [1, 2] : vector<1x8x8xf32> to vector<1xf32>
      %76 = vector.shape_cast %75 : vector<1xf32> to vector<1x1x1xf32>
      %77 = vector.extract %76[0, 0, 0] : f32 from vector<1x1x1xf32>
      %cst_31 = arith.constant 4.500000e+01 : f32
      %78 = vector.broadcast %cst_31 : f32 to vector<1x8xf32>
      %79 = arith.mulf %39, %78 : vector<1x8xf32>
      %80 = arith.subf %25, %79 : vector<1x8xf32>
      %81 = vector.broadcast %cst_5 : f32 to vector<1x8xf32>
      %82 = arith.mulf %80, %81 : vector<1x8xf32>
      %c0_32 = arith.constant 0 : index
      %c0_33 = arith.constant 0 : index
      %c0_34 = arith.constant 0 : index
      %83 = vector.load %arg4[%c0_32, %c0_33, %c0_34] : memref<1x1x128xf32, #tpu.memory_space<vmem>>, vector<1x1x128xf32>
      %84 = vector.shape_cast %36 : vector<1x8xf32> to vector<1x1x8xf32>
      %cst_35 = arith.constant dense<0.000000e+00> : vector<1xf32>
      %85 = vector.multi_reduction <add>, %84, %cst_35 [1, 2] : vector<1x1x8xf32> to vector<1xf32>
      %86 = vector.shape_cast %85 : vector<1xf32> to vector<1x1x1xf32>
      %87 = vector.extract %86[0, 0, 0] : f32 from vector<1x1x1xf32>
      %88 = arith.mulf %87, %cst_6 : f32
      %89 = vector.broadcast %88 : f32 to vector<1x1x128xf32>
      %90 = arith.addf %83, %89 : vector<1x1x128xf32>
      %c0_36 = arith.constant 0 : index
      %c0_37 = arith.constant 0 : index
      %c0_38 = arith.constant 0 : index
      %91 = vector.load %arg4[%c0_36, %c0_37, %c0_38] : memref<1x1x128xf32, #tpu.memory_space<vmem>>, vector<1x1x128xf32>
      tpu.vector_store %arg4[%c0_36, %c0_37, %c0_38], %90 {strides = array<i32>} : memref<1x1x128xf32, #tpu.memory_space<vmem>>, vector<1x1x128xf32>,
      %c0_39 = arith.constant 0 : index
      %c0_40 = arith.constant 0 : index
      %c0_41 = arith.constant 0 : index
      %92 = vector.load %arg5[%c0_39, %c0_40, %c0_41] : memref<1x1x128xf32, #tpu.memory_space<vmem>>, vector<1x1x128xf32>
      %93 = arith.mulf %61, %cst_6 : f32
      %94 = vector.broadcast %93 : f32 to vector<1x1x128xf32>
      %95 = arith.addf %92, %94 : vector<1x1x128xf32>
      %c0_42 = arith.constant 0 : index
      %c0_43 = arith.constant 0 : index
      %c0_44 = arith.constant 0 : index
      %96 = vector.load %arg5[%c0_42, %c0_43, %c0_44] : memref<1x1x128xf32, #tpu.memory_space<vmem>>, vector<1x1x128xf32>
      tpu.vector_store %arg5[%c0_42, %c0_43, %c0_44], %95 {strides = array<i32>} : memref<1x1x128xf32, #tpu.memory_space<vmem>>, vector<1x1x128xf32>,
      %c0_45 = arith.constant 0 : index
      %c0_46 = arith.constant 0 : index
      %c0_47 = arith.constant 0 : index
      %97 = vector.load %arg6[%c0_45, %c0_46, %c0_47] : memref<1x1x128xf32, #tpu.memory_space<vmem>>, vector<1x1x128xf32>
      %98 = arith.mulf %69, %cst_6 : f32
      %99 = vector.broadcast %98 : f32 to vector<1x1x128xf32>
      %100 = arith.addf %97, %99 : vector<1x1x128xf32>
      %c0_48 = arith.constant 0 : index
      %c0_49 = arith.constant 0 : index
      %c0_50 = arith.constant 0 : index
      %101 = vector.load %arg6[%c0_48, %c0_49, %c0_50] : memref<1x1x128xf32, #tpu.memory_space<vmem>>, vector<1x1x128xf32>
      tpu.vector_store %arg6[%c0_48, %c0_49, %c0_50], %100 {strides = array<i32>} : memref<1x1x128xf32, #tpu.memory_space<vmem>>, vector<1x1x128xf32>,
      %c0_51 = arith.constant 0 : index
      %c0_52 = arith.constant 0 : index
      %c0_53 = arith.constant 0 : index
      %102 = vector.load %arg7[%c0_51, %c0_52, %c0_53] : memref<1x1x128xf32, #tpu.memory_space<vmem>>, vector<1x1x128xf32>
      %103 = arith.mulf %77, %cst_6 : f32
      %104 = vector.broadcast %103 : f32 to vector<1x1x128xf32>
      %105 = arith.addf %102, %104 : vector<1x1x128xf32>
      %c0_54 = arith.constant 0 : index
      %c0_55 = arith.constant 0 : index
      %c0_56 = arith.constant 0 : index
      %106 = vector.load %arg7[%c0_54, %c0_55, %c0_56] : memref<1x1x128xf32, #tpu.memory_space<vmem>>, vector<1x1x128xf32>
      tpu.vector_store %arg7[%c0_54, %c0_55, %c0_56], %105 {strides = array<i32>} : memref<1x1x128xf32, #tpu.memory_space<vmem>>, vector<1x1x128xf32>,
      %c0_57 = arith.constant 0 : index
      %c0_58 = arith.constant 0 : index
      %c0_59 = arith.constant 0 : index
      %107 = vector.load %arg8[%c0_57, %c0_58, %c0_59] : memref<1x1x128xf32, #tpu.memory_space<vmem>>, vector<1x1x128xf32>
      %108 = vector.shape_cast %82 : vector<1x8xf32> to vector<1x1x8xf32>
      %cst_60 = arith.constant dense<0.000000e+00> : vector<1xf32>
      %109 = vector.multi_reduction <add>, %108, %cst_60 [1, 2] : vector<1x1x8xf32> to vector<1xf32>
      %110 = vector.shape_cast %109 : vector<1xf32> to vector<1x1x1xf32>
      %111 = vector.extract %110[0, 0, 0] : f32 from vector<1x1x1xf32>
      %112 = arith.mulf %111, %cst_6 : f32
      %113 = vector.broadcast %112 : f32 to vector<1x1x128xf32>
      %114 = arith.addf %107, %113 : vector<1x1x128xf32>
      %c0_61 = arith.constant 0 : index
      %c0_62 = arith.constant 0 : index
      %c0_63 = arith.constant 0 : index
      %115 = vector.load %arg8[%c0_61, %c0_62, %c0_63] : memref<1x1x128xf32, #tpu.memory_space<vmem>>, vector<1x1x128xf32>
      tpu.vector_store %arg8[%c0_61, %c0_62, %c0_63], %114 {strides = array<i32>} : memref<1x1x128xf32, #tpu.memory_space<vmem>>, vector<1x1x128xf32>,
    } else {
    }
    return
  }
  func.func @transform_0(%arg0: i32, %arg1: i32) -> (i32, i32) {
    %c1_i32 = arith.constant 1 : i32
    %0 = arith.muli %arg0, %c1_i32 : i32
    %1 = arith.addi %0, %arg1 : i32
    %c0_i32 = arith.constant 0 : i32
    %2 = arith.minsi %1, %c0_i32 : i32
    %c0_i32_0 = arith.constant 0 : i32
    %c0_i32_1 = arith.constant 0 : i32
    return %c0_i32_0, %2 : i32, i32
  }
  func.func @transform_1(%arg0: i32, %arg1: i32) -> (i32, i32) {
    %c1_i32 = arith.constant 1 : i32
    %0 = arith.muli %arg0, %c1_i32 : i32
    %1 = arith.addi %0, %arg1 : i32
    %c0_i32 = arith.constant 0 : i32
    %2 = arith.minsi %1, %c0_i32 : i32
    %c0_i32_0 = arith.constant 0 : i32
    %c0_i32_1 = arith.constant 0 : i32
    return %c0_i32_0, %2 : i32, i32
  }
  func.func @transform_2(%arg0: i32, %arg1: i32) -> (i32, i32, i32) {
    %c0_i32 = arith.constant 0 : i32
    %c0_i32_0 = arith.constant 0 : i32
    %c0_i32_1 = arith.constant 0 : i32
    return %arg0, %c0_i32, %c0_i32_0 : i32, i32, i32
  }
  func.func @transform_3(%arg0: i32, %arg1: i32) -> (i32, i32, i32) {
    %c0_i32 = arith.constant 0 : i32
    %c0_i32_0 = arith.constant 0 : i32
    %c0_i32_1 = arith.constant 0 : i32
    return %arg0, %c0_i32, %c0_i32_0 : i32, i32, i32
  }
  func.func @transform_4(%arg0: i32, %arg1: i32) -> (i32, i32, i32) {
    %c0_i32 = arith.constant 0 : i32
    %c0_i32_0 = arith.constant 0 : i32
    %c0_i32_1 = arith.constant 0 : i32
    return %arg0, %c0_i32, %c0_i32_0 : i32, i32, i32
  }
  func.func @transform_5(%arg0: i32, %arg1: i32) -> (i32, i32, i32) {
    %c0_i32 = arith.constant 0 : i32
    %c0_i32_0 = arith.constant 0 : i32
    %c0_i32_1 = arith.constant 0 : i32
    return %arg0, %c0_i32, %c0_i32_0 : i32, i32, i32
  }
  func.func @transform_6(%arg0: i32, %arg1: i32) -> (i32, i32, i32) {
    %c0_i32 = arith.constant 0 : i32
    %c0_i32_0 = arith.constant 0 : i32
    %c0_i32_1 = arith.constant 0 : i32
    return %arg0, %c0_i32, %c0_i32_0 : i32, i32, i32
  }
}

</mosaic_0001>

<bundles_post_ra>
// kernel: tpu_custom_call.1
= control target key start
LH: loop header
LB: loop body
LE: loop exit
PB: predicated region body
PF: predicated region fallthrough
CT: control target
= control target key end

     0   :  { %12 = vsyncpa [#allocation4], 0  ;;  %s657_s0 = inlined_call_operand.hbm [shape: f32[8,8], index: 0, kind: input, shape index: {}]   ;;  %s658_s1 = inlined_call_operand.vmem [shape: f32[1,8], index: 1, kind: input, shape index: {}]   ;;  %s659_s2 = inlined_call_operand.hbm [shape: f32[1,1,128], index: 2, kind: output, shape index: {0}]   ;;  %s660_s3 = inlined_call_operand.hbm [shape: f32[1,1,128], index: 3, kind: output, shape index: {1}]   ;;  %s661_s4 = inlined_call_operand.hbm [shape: f32[1,1,128], index: 4, kind: output, shape index: {2}]   ;;  %s662_s5 = inlined_call_operand.hbm [shape: f32[1,1,128], index: 5, kind: output, shape index: {3}]   ;;  %s663_s6 = inlined_call_operand.hbm [shape: f32[1,1,128], index: 6, kind: output, shape index: {4}]  }
   0x1   :  { %13 = vsyncpa [#allocation5], 0 }
   0x2   :  { %14 = vsyncpa [#allocation8], 0 }
   0x3   :  { %15 = vsyncpa [#allocation11], 0  ;;  %s586_s21 = smov [#allocation3]  }
   0x4   :  { %s27_s22 = sshll.u32 %s586_s21, 4  ;;  %s28_s22 = int_to_ptr.vmem [resolvable:$true] %s27_s22 }
   0x5   :  { %s466_s23 = scalar_lea.vmem %s28_s22, 128  ;;  %p471_p1 = scmp.lt.s32.totalorder %s28_s22, %s28_s22 }
   0x6   :  { %p467_p0 = scmp.ne.s32.totalorder %s28_s22, %s466_s23  ;;  %p472_p2 = scmp.lt.s32.totalorder %s466_s23, %s466_s23 }
   0x8   :  { %p473_p3 = por %p472_p2, %p471_p1 }
   0xa   :  { %p474_p4 = pnand %p473_p3, %p467_p0 }
   0xc   :  { %477 = shalt.err (!%p474_p4)
}
   0xd   :  { %30 = dma.hbm_to_vmem [thread:$0]  %s657_s0, 128, %s28_s22, [#allocation4]  }
   0xe   :  { %578 = dma.done.wait [#allocation4], 128  }
   0xf   :  { %579 = vsyncadd [#allocation4], 4294967168  ;;  %v67_v0 = vlaneseq  ;;  %vm69_vm0 = vcmask 64512   ;;  %v84_v2 = vld [vmem:[#allocation3] sm:$0xff]  ;;  %v85_v3 = vld [vmem:[%s658_s1] sm:$0x1] }
  0x10   :  { %v108_v4 = vmul.f32 0.022222223, %v85_v3  ;;  %v87_v5 = vsel %vm69_vm0, %v84_v2, -inf  ;;  %vm170_vm6 = vcmask 57344   ;;  %v587_v48 = vmov 0.0   ;;  %s588_s1 = smov [#allocation7]  }
  0x11   :  { %v68_v1 = vshrl.u32 %v67_v0, 7  ;;  %v88_v6 = vrot.slane %v87_v5, 4  ;;  %72 = vst [vmem:[#allocation7] sm:$0x1] %v587_v48  ;;  %71 = vst [vmem:[#allocation6] sm:$0x1] %v587_v48 }
  0x12   :  { %v109_v7 = vfloor.f32 %v108_v4  ;;  %73 = vst [vmem:[#allocation9] sm:$0x1] %v587_v48  ;;  %74 = vst [vmem:[#allocation10] sm:$0x1] %v587_v48  ;;  %s375_s28 = sshll.u32 %s588_s1, 4  ;;  %s589_s7 = smov [#allocation9]   ;;  %s376_s28 = int_to_ptr.vmem [resolvable:$true] %s375_s28 }
  0x13   :  { %70 = vst.msk [vmem:[#allocation2] sm:$0xff] %vm69_vm0, %v68_v1  ;;  %v89_v8 = vmax.f32 %v87_v5, %v88_v6  ;;  %v120_v10 = vsub.s32 0, %v68_v1  ;;  %75 = vst [vmem:[#allocation12] sm:$0x1] %v587_v48  ;;  %s385_s8 = sshll.u32 %s589_s7, 4  ;;  %s590_s12 = smov [#allocation10]   ;;  %s386_s8 = int_to_ptr.vmem [resolvable:$true] %s385_s8 }
  0x14   :  { %v435_v9 = vtrunc.f32 %v109_v7  ;;  %v166_v13 = vmul.f32 45.0, %v109_v7  ;;  %s395_s13 = sshll.u32 %s590_s12, 4  ;;  %s478_s14 = scalar_lea.vmem %s376_s28, 16  ;;  %s396_s13 = int_to_ptr.vmem [resolvable:$true] %s395_s13 }
  0x15   :  { %v90_v11 = vrot.slane %v89_v8, 2  ;;  %p479_p5 = scmp.ne.s32.totalorder %s376_s28, %s478_s14  ;;  %s482_s15 = scalar_lea.vmem %s376_s28, 32 }
  0x16   :  { %v436_v12 = vcvt.f32.s32 %v435_v9  ;;  %v167_v21 = vsub.f32 %v85_v3, %v166_v13  ;;  %p483_p6 = scmp.lt.s32.totalorder %s376_s28, %s376_s28  ;;  %p484_p7 = scmp.lt.s32.totalorder %s482_s15, %s478_s14 }
  0x17   :  { %v91_v15 = vmax.f32 %v89_v8, %v90_v11 }
  0x18   :  { %v121_v16 = vrot.slane %v436_v12, %v120_v10  ;;  %vm114_vm1 = vcmp.eq.s32.totalorder %v436_v12, 7  ;;  %v115_v17 = vadd.s32 1, %v436_v12  ;;  %vm111_vm2 = vcmp.eq.s32.totalorder %v436_v12, 0  ;;  %p485_p8 = por %p484_p7, %p483_p6 }
  0x19   :  { %v433_v18 = vadd.s32 4294967295, %v436_v12  ;;  %v92_v19 = vrot.slane %v91_v15, 1  ;;  %v168_v29 = vmul.f32 0.022222223, %v167_v21 }
  0x1a   :  { %v117_v14 = vld [vmem:[#allocation2] sm:$0xff]  ;;  %v116_v20 = vsel %vm114_vm1, 0, %v115_v17  ;;  %p486_p9 = pnand %p485_p8, %p479_p5 }
  0x1b   :  { %vm122_vm3 = vcmp.eq.s32.totalorder %v117_v14, %v121_v16  ;;  %v153_v23 = vrot.slane %v116_v20, %v120_v10  ;;  %v113_v24 = vsel %vm111_vm2, 7, %v433_v18  ;;  %v93_v27 = vmax.f32 %v91_v15, %v92_v19  ;;  %v185_v20 = vld [vmem:[#allocation7] sm:$0x1] }
  0x1c   :  { %v123_v22 = vsel %vm122_vm3, %v84_v2, 0.0  ;;  %v137_v26 = vrot.slane %v113_v24, %v120_v10  ;;  %v201_v35 = vsel %vm170_vm6, %v168_v29, 0.0  ;;  %v195_v24 = vld [vmem:[#allocation10] sm:$0x1] }
  0x1d   :  { %v124_v25 = vsel %vm69_vm0, %v123_v22, 0.0  ;;  %vm154_vm4 = vcmp.eq.s32.totalorder %v117_v14, %v153_v23  ;;  %v94_v30 = vsub.f32 %v84_v2, %v93_v27  ;;  %v190_v23 = vld [vmem:[#allocation9] sm:$0x1] }
  0x1e   :  { %125 = vadd.xlane.f32.xlu0 %v124_v25  ;;  %v155_v28 = vsel %vm154_vm4, %v84_v2, 0.0  ;;  %vm138_vm5 = vcmp.eq.s32.totalorder %v117_v14, %v137_v26 }
  0x1f   :  { %v156_v31 = vsel %vm69_vm0, %v155_v28, 0.0  ;;  %v139_v32 = vsel %vm138_vm5, %v84_v2, 0.0  ;;  %v95_v34 = vmul.f32 1.442695, %v94_v30 }
  0x20   :  { %157 = vadd.xlane.f32.xlu1 %v156_v31  ;;  %v140_v33 = vsel %vm69_vm0, %v139_v32, 0.0 }
  0x21   :  { %454 = vpow2.f32 %v95_v34 }
  0x22   :  { %141 = vadd.xlane.f32.xlu0 %v140_v33 }
  0x26   :  { %202 = vadd.xlane.f32.xlu0 %v201_v35 }
  0x2e   :  { %v455_v36 = vpop.eup %454 }
  0x2f   :  { %v97_v37 = vsel %vm69_vm0, %v455_v36, 0.0 }
  0x30   :  { %v98_v38 = vrot.slane %v97_v37, 4 }
  0x32   :  { %v99_v39 = vadd.f32 %v98_v38, %v97_v37 }
  0x34   :  { %v100_v40 = vrot.slane %v99_v39, 2 }
  0x36   :  { %v101_v41 = vadd.f32 %v100_v40, %v99_v39 }
  0x38   :  { %v102_v42 = vrot.slane %v101_v41, 1 }
  0x3a   :  { %v103_v43 = vadd.f32 %v102_v42, %v101_v41 }
  0x3c   :  { %456 = vlog2.f32 %v103_v43 }
  0x49   :  { %v457_v44 = vpop.eup %456 }
  0x4a   :  { %v105_v45 = vmul.f32 0.6931472, %v457_v44 }
  0x4c   :  { %v106_v46 = vadd.f32 %v105_v45, %v93_v27 }
  0x4e   :  { %v171_v47 = vsel %vm170_vm6, %v106_v46, 0.0 }
  0x4f   :  { %172 = vadd.xlane.f32.xlu1 %v171_v47 }
  0xa7   :  { %v126_v49 = vpop.xlane.xlu0 %125 }
  0xa8   :  { %v127_v50 = vrot.slane %v126_v49, 4 }
  0xa9   :  { %v158_v52 = vpop.xlane.xlu1 %157 }
  0xaa   :  { %v128_v51 = vadd.f32 %v127_v50, %v126_v49  ;;  %v159_v53 = vrot.slane %v158_v52, 4 }
  0xab   :  { %v142_v54 = vpop.xlane.xlu0 %141 }
  0xac   :  { %v129_v55 = vrot.slane %v128_v51, 2  ;;  %v143_v56 = vrot.slane %v142_v54, 4  ;;  %v160_v57 = vadd.f32 %v159_v53, %v158_v52 }
  0xae   :  { %v144_v58 = vadd.f32 %v143_v56, %v142_v54  ;;  %v130_v59 = vadd.f32 %v129_v55, %v128_v51  ;;  %v161_v60 = vrot.slane %v160_v57, 2 }
  0xaf   :  { %v203_v6 = vpop.xlane.xlu0 %202 }
  0xb0   :  { %v145_v61 = vrot.slane %v144_v58, 2  ;;  %v131_v62 = vrot.slane %v130_v59, 1  ;;  %v162_v63 = vadd.f32 %v161_v60, %v160_v57  ;;  %v204_v7 = vrot.slane %v203_v6, 4 }
  0xb2   :  { %v132_v0 = vadd.f32 %v131_v62, %v130_v59  ;;  %v146_v1 = vadd.f32 %v145_v61, %v144_v58  ;;  %v163_v2 = vrot.slane %v162_v63, 1  ;;  %v205_v8 = vadd.f32 %v204_v7, %v203_v6 }
  0xb4   :  { %437 = vpush %v132_v0  ;;  %v147_v3 = vrot.slane %v146_v1, 1  ;;  %v164_v4 = vadd.f32 %v163_v2, %v162_v63  ;;  %v206_v9 = vrot.slane %v205_v8, 2 }
  0xb6   :  { %v148_v5 = vadd.f32 %v147_v3, %v146_v1  ;;  %v207_v13 = vadd.f32 %v206_v9, %v205_v8 }
  0xb8   :  { %439 = vpush %v148_v5  ;;  %v208_v16 = vrot.slane %v207_v13, 1 }
  0xb9   :  { %441 = vpush %v164_v4 }
  0xba   :  { %v209_v19 = vadd.f32 %v208_v16, %v207_v13 }
  0xd8   :  { %v173_v10 = vpop.xlane.xlu1 %172 }
  0xd9   :  { %v174_v11 = vrot.slane %v173_v10, 4 }
  0xdb   :  { %v175_v12 = vadd.f32 %v174_v11, %v173_v10 }
  0xdd   :  { %v176_v14 = vrot.slane %v175_v12, 2 }
  0xdf   :  { %v177_v15 = vadd.f32 %v176_v14, %v175_v12 }
  0xe1   :  { %v178_v17 = vrot.slane %v177_v15, 1 }
  0xe3   :  { %v179_v18 = vadd.f32 %v178_v17, %v177_v15 }
  0xe5   :  { %s438_s0 = spop %437  ;;  %443 = vpush %v179_v18 }
  0xe6   :  { %s186_s29 = smul.f32 0.125, %s438_s0  ;;  %445 = vpush %v209_v19 }
  0xe8   :  { %v187_v21 = vstv %s186_s29 }
  0xe9   :  { %v188_v22 = vadd.f32 %v187_v21, %v185_v20  ;;  %s440_s30 = spop %439 }
  0xea   :  { %s191_s9 = smul.f32 0.125, %s440_s30  ;;  %s442_s10 = spop %441 }
  0xeb   :  { %189 = vst [vmem:[#allocation7] sm:$0x1] %v188_v22  ;;  %s196_s11 = smul.f32 0.125, %s442_s10 }
  0xec   :  { %v192_v25 = vstv %s191_s9 }
  0xed   :  { %489 = shalt.err (!%p486_p9)
}
  0xee   :  { %378 = dma.vmem_to_hbm [thread:$0]  %s376_s28, 16, %s660_s3, [#allocation8]   ;;  %v193_v26 = vadd.f32 %v192_v25, %v190_v23  ;;  %v197_v27 = vstv %s196_s11 }
  0xef   :  { %v198_v28 = vadd.f32 %v197_v27, %v195_v24  ;;  %s498_s18 = scalar_lea.vmem %s386_s8, 16  ;;  %s502_s19 = scalar_lea.vmem %s386_s8, 32 }
  0xf0   :  { %194 = vst [vmem:[#allocation9] sm:$0x1] %v193_v26  ;;  %p499_p10 = scmp.ne.s32.totalorder %s386_s8, %s498_s18  ;;  %p503_p11 = scmp.lt.s32.totalorder %s386_s8, %s386_s8 }
  0xf1   :  { %199 = vst [vmem:[#allocation10] sm:$0x1] %v198_v28  ;;  %p504_p12 = scmp.lt.s32.totalorder %s502_s19, %s498_s18 }
  0xf3   :  { %p505_p13 = por %p504_p12, %p503_p11 }
  0xf5   :  { %p506_p0 = pnand %p505_p13, %p499_p10 }
  0xf7   :  { %509 = shalt.err (!%p506_p0)
}
  0xf8   :  { %388 = dma.vmem_to_hbm [thread:$0]  %s386_s8, 16, %s661_s4, [#allocation8]  }
  0xf9   :  { %s518_s3 = scalar_lea.vmem %s396_s13, 16  ;;  %s522_s22 = scalar_lea.vmem %s396_s13, 32 }
  0xfa   :  { %p519_p1 = scmp.ne.s32.totalorder %s396_s13, %s518_s3  ;;  %p523_p2 = scmp.lt.s32.totalorder %s396_s13, %s396_s13 }
  0xfb   :  { %p524_p3 = scmp.lt.s32.totalorder %s522_s22, %s518_s3 }
  0xfd   :  { %p525_p4 = por %p524_p3, %p523_p2 }
  0xff   :  { %p526_p5 = pnand %p525_p4, %p519_p1 }
 0x101   :  { %529 = shalt.err (!%p526_p5)
}
 0x102   :  { %398 = dma.vmem_to_hbm [thread:$0]  %s396_s13, 16, %s662_s5, [#allocation11]   ;;  %v169_v29 = vld [vmem:[#allocation6] sm:$0x1]  ;;  %v200_v30 = vld [vmem:[#allocation12] sm:$0x1] }
 0x103   :  { %s591_s26 = smov [#allocation6]   ;;  %s592_s28 = smov [#allocation12]  }
 0x104   :  { %s365_s27 = sshll.u32 %s591_s26, 4  ;;  %s405_s29 = sshll.u32 %s592_s28, 4  ;;  %s366_s27 = int_to_ptr.vmem [resolvable:$true] %s365_s27  ;;  %s406_s29 = int_to_ptr.vmem [resolvable:$true] %s405_s29 }
 0x105   :  { %s538_s30 = scalar_lea.vmem %s366_s27, 16  ;;  %s542_s5 = scalar_lea.vmem %s366_s27, 32 }
 0x106   :  { %p539_p6 = scmp.ne.s32.totalorder %s366_s27, %s538_s30  ;;  %p543_p7 = scmp.lt.s32.totalorder %s366_s27, %s366_s27 }
 0x107   :  { %p544_p8 = scmp.lt.s32.totalorder %s542_s5, %s538_s30 }
 0x109   :  { %p545_p9 = por %p544_p8, %p543_p7 }
 0x10b   :  { %p546_p10 = pnand %p545_p9, %p539_p6 }
 0x116   :  { %s444_s25 = spop %443 }
 0x117   :  { %s181_s0 = smul.f32 0.125, %s444_s25  ;;  %s446_s1 = spop %445 }
 0x118   :  { %s211_s4 = smul.f32 0.125, %s446_s1 }
 0x119   :  { %v182_v31 = vstv %s181_s0 }
 0x11a   :  { %v183_v32 = vadd.f32 %v182_v31, %v169_v29  ;;  %v212_v33 = vstv %s211_s4 }
 0x11b   :  { %v213_v34 = vadd.f32 %v212_v33, %v200_v30 }
 0x11c   :  { %184 = vst [vmem:[#allocation6] sm:$0x1] %v183_v32 }
 0x11d   :  { %214 = vst [vmem:[#allocation12] sm:$0x1] %v213_v34 }
 0x11e   :  { %549 = shalt.err (!%p546_p10)
}
 0x11f   :  { %368 = dma.vmem_to_hbm [thread:$0]  %s366_s27, 16, %s659_s2, [#allocation5]  }
 0x120   :  { %s558_s9 = scalar_lea.vmem %s406_s29, 16  ;;  %s562_s10 = scalar_lea.vmem %s406_s29, 32 }
 0x121   :  { %p559_p11 = scmp.ne.s32.totalorder %s406_s29, %s558_s9  ;;  %p563_p12 = scmp.lt.s32.totalorder %s406_s29, %s406_s29 }
 0x122   :  { %p564_p13 = scmp.lt.s32.totalorder %s562_s10, %s558_s9 }
 0x124   :  { %p565_p0 = por %p564_p13, %p563_p12 }
 0x126   :  { %p566_p1 = pnand %p565_p0, %p559_p11 }
 0x128   :  { %569 = shalt.err (!%p566_p1)
}
 0x129   :  { %408 = dma.vmem_to_hbm [thread:$0]  %s406_s29, 16, %s663_s6, [#allocation11]  }
 0x12a   :  { %580 = dma.done.wait [#allocation5], 16  }
 0x12b   :  { %581 = vsyncadd [#allocation5], 4294967280 }
 0x12c   :  { %582 = dma.done.wait [#allocation8], 32  }
 0x12d   :  { %583 = vsyncadd [#allocation8], 4294967264 }
 0x12e   :  { %584 = dma.done.wait [#allocation11], 32  }
 0x12f   :  { %585 = vsyncadd [#allocation11], 4294967264 }
 0x130   :  { %424 = vsyncpa [#allocation4], 1 }
 0x131   :  { %425 = vsyncpa [#allocation5], 1 }
 0x132   :  { %426 = vsyncpa [#allocation8], 1 }
 0x133   :  { %427 = vsyncpa [#allocation11], 1 }

</bundles_post_ra>
